<compile_context>
chip_gen: v7x
topology: tpu7x:2x2x1
jax: 0.10.0
libtpu: 0.0.40
codegen_flags: <defaults>
</compile_context>

<pallas_src>
import functools

import jax
import jax.numpy as jnp
from jax.experimental import pallas as pl
from jax.experimental.pallas import tpu as pltpu


def _salience_kernel(x1_ref, x2_ref, out_ref, acc_ref, *,
                     channels, rows_total, rows_per_block,
                     tiles_per_chunk, needs_mask):
    j = pl.program_id(2)

    @pl.when(j == 0)
    def _init():
        acc_ref[...] = jnp.zeros_like(acc_ref)

    # Dense (R, 128) slabs: R rows on sublanes, 128 spatial elements on lanes.
    x1_0 = x1_ref[0, 0].astype(jnp.float32)
    x2_0 = x2_ref[0, 0].astype(jnp.float32)

    # Class-0 probability: p0 = 1 / (1 + sum_{c>=1} exp(x_c - x_0)).
    # The c = 0 term is exp(0) = 1 (folded into the initializer), so the denominator is
    # always >= 1 and no max pass is needed; exp overflow to +inf gives 1/inf -> 0.
    z1 = jnp.ones_like(x1_0)
    z2 = jnp.ones_like(x2_0)
    for ch in range(1, channels):            # static unroll over the small channel axis
        z1 = z1 + jnp.exp(x1_ref[0, ch].astype(jnp.float32) - x1_0)
        z2 = z2 + jnp.exp(x2_ref[0, ch].astype(jnp.float32) - x2_0)

    d = 1.0 / z1 - 1.0 / z2                  # exact reciprocal; denominators >= 1
    sq = d * d                               # (R, 128)

    if needs_mask:
        # Global row index of this block's first sublane row (chunk-aware).
        row_start = (pl.program_id(1) * tiles_per_chunk + j) * rows_per_block
        is_ragged = row_start + rows_per_block > rows_total

        @pl.when(is_ragged)                  # only trailing / over-run blocks pay for this
        def _masked_add():
            rows = jax.lax.broadcasted_iota(jnp.int32, sq.shape, 0) + row_start
            # Mask applied post-arithmetic: jnp.where is a true select, so NaN/Inf from
            # out-of-bounds garbage rows is discarded.
            acc_ref[...] += jnp.where(rows < rows_total, sq, 0.0)

        @pl.when(jnp.logical_not(is_ragged))
        def _plain_add():
            acc_ref[...] += sq
    else:
        acc_ref[...] += sq

    @pl.when(j == pl.num_programs(2) - 1)
    def _finalize():
        out_ref[...] = jnp.sum(acc_ref[...]).reshape(1, 1, 1, 1)


def _rows_per_block(rows_total, channels, itemsize, target_bytes):
    """Sublane-rows per input block: multiple of native sublane count, ~target_bytes."""
    sub = {4: 8, 2: 16, 1: 32}.get(itemsize, 8)
    if rows_total <= sub:
        return int(rows_total)               # block dim == full array dim (allowed)
    r = (target_bytes // (channels * 128 * itemsize)) // sub * sub
    r = max(sub, min(r, (rows_total // sub) * sub))
    return int(r)


@functools.partial(jax.jit, static_argnames=("target_bytes",))
def change_salience_loss(x1, x2, label_change=None, *, target_bytes=2 << 20):
    """x1, x2: (B, C, H, W) logits (NCHW, like PyTorch). Returns scalar loss.

    label_change is accepted for API parity but unused (as in the reference forward).
    """
    b, c, h, w = x1.shape
    s_total = h * w
    n_valid = b * s_total

    x1r = x1.reshape(b, c, s_total)
    x2r = x2.reshape(b, c, s_total)

    # Pad the spatial axis to a multiple of 128 lanes.  Both inputs get identical zero
    # padding, so padded columns give p1 = p2 = 1/C and contribute exactly 0 to the sum.
    rem = s_total % 128
    if rem:
        pad = 128 - rem
        x1r = jnp.pad(x1r, ((0, 0), (0, 0), (0, pad)))
        x2r = jnp.pad(x2r, ((0, 0), (0, 0), (0, pad)))
    s_pad = x1r.shape[-1]
    rows_total = s_pad // 128

    # Dense layout: (B, C, rows, 128) — free reshape; spatial now fills whole vregs.
    x1r = x1r.reshape(b, c, rows_total, 128)
    x2r = x2r.reshape(b, c, rows_total, 128)

    itemsize = jnp.dtype(x1.dtype).itemsize
    rpb = _rows_per_block(rows_total, c, itemsize, target_bytes)
    num_tiles = pl.cdiv(rows_total, rpb)

    # Give the second TensorCore (v7x) spatial work when the batch is tiny.
    n_chunks = 2 if (b < 2 and num_tiles >= 2) else 1
    tiles_per_chunk = pl.cdiv(num_tiles, n_chunks)
    needs_mask = (n_chunks * tiles_per_chunk * rpb) != rows_total

    if n_chunks * tiles_per_chunk > num_tiles:
        def tile_idx(chunk, j):              # clamp over-run tiles; kernel mask zeros them
            return jnp.minimum(chunk * tiles_per_chunk + j, num_tiles - 1)
    else:
        def tile_idx(chunk, j):
            return chunk * tiles_per_chunk + j

    in_spec = pl.BlockSpec((1, c, rpb, 128),
                           lambda i, ch, j: (i, 0, tile_idx(ch, j), 0))

    kernel = functools.partial(
        _salience_kernel, channels=c, rows_total=rows_total,
        rows_per_block=rpb, tiles_per_chunk=tiles_per_chunk,
        needs_mask=needs_mask)

    n_elems = b * s_pad
    cost = pl.CostEstimate(
        flops=int(8 * c * n_elems),
        transcendentals=int(2 * c * n_elems),
        bytes_accessed=int(2 * x1r.size * itemsize + b * n_chunks * 4))

    partial_sums = pl.pallas_call(
        kernel,
        out_shape=jax.ShapeDtypeStruct((b, n_chunks, 1, 1), jnp.float32),
        grid_spec=pltpu.PrefetchScalarGridSpec(
            num_scalar_prefetch=0,
            grid=(b, n_chunks, tiles_per_chunk),
            in_specs=[in_spec, in_spec],
            out_specs=pl.BlockSpec((1, 1, 1, 1), lambda i, ch, j: (i, ch, 0, 0)),
            scratch_shapes=[pltpu.VMEM((rpb, 128), jnp.float32)],
        ),
        compiler_params=pltpu.CompilerParams(
            dimension_semantics=("parallel", "parallel", "arbitrary"),
            vmem_limit_bytes=32 * 1024 * 1024,
        ),
        cost_estimate=cost,
    )(x1r, x2r)

    mse = jnp.sum(partial_sums) / n_valid
    # Forward value: MSE(p1, sg(p2)) == MSE(p2, sg(p1)) == mean((p1 - p2)^2).
    return 0.5 * (mse + mse)


def _reference(x1, x2):
    p1 = jax.nn.softmax(x1, axis=1)[:, 0, :, :]
    p2 = jax.nn.softmax(x2, axis=1)[:, 0, :, :]
    mse = lambda a, b: jnp.mean((a - b) ** 2)
    return 0.5 * (mse(p1, p2) + mse(p2, p1))


if __name__ == "__main__":
    key = jax.random.PRNGKey(0)
    k1, k2, k3 = jax.random.split(key, 3)

    # Small demo shape consistent with the module.
    B, C, H, W = 2, 4, 16, 16
    x1 = jax.random.normal(k1, (B, C, H, W), dtype=jnp.float32)
    x2 = jax.random.normal(k2, (B, C, H, W), dtype=jnp.float32)
    label_change = (jax.random.uniform(k3, (B, H, W)) > 0.5).astype(jnp.float32)

    loss = jax.block_until_ready(change_salience_loss(x1, x2, label_change))
    ref = _reference(x1, x2)
    assert jnp.allclose(loss, ref, rtol=1e-3, atol=1e-6), (loss, ref)

    # Ragged spatial size (S % 128 != 0) exercises the zero-pad path.
    y1 = jax.random.normal(k1, (B, C, 17, 17), dtype=jnp.float32)
    y2 = jax.random.normal(k2, (B, C, 17, 17), dtype=jnp.float32)
    loss2 = jax.block_until_ready(change_salience_loss(y1, y2))
    ref2 = _reference(y1, y2)
    assert jnp.allclose(loss2, ref2, rtol=1e-3, atol=1e-6), (loss2, ref2)

    # B=1 with a tiny tile budget exercises multi-tile accumulation, the spatial-chunk
    # ("second TC") grid axis, the ragged-row mask, and the clamped over-run tile.
    z1 = jax.random.normal(k1, (1, C, 48, 48), dtype=jnp.float32)
    z2 = jax.random.normal(k2, (1, C, 48, 48), dtype=jnp.float32)
    loss3 = jax.block_until_ready(change_salience_loss(z1, z2, target_bytes=16 * 1024))
    ref3 = _reference(z1, z2)
    assert jnp.allclose(loss3, ref3, rtol=1e-3, atol=1e-6), (loss3, ref3)

    # bf16 inputs use the same dense layout (16-row sublane granularity).
    w1 = jax.random.normal(k1, (B, C, 32, 32), dtype=jnp.bfloat16)
    w2 = jax.random.normal(k2, (B, C, 32, 32), dtype=jnp.bfloat16)
    loss4 = jax.block_until_ready(change_salience_loss(w1, w2))
    ref4 = _reference(w1.astype(jnp.float32), w2.astype(jnp.float32))
    assert jnp.allclose(loss4, ref4, rtol=2e-2, atol=1e-4), (loss4, ref4)

    print("KERNEL_OK")
</pallas_src>

<mosaic_0001>
module attributes {stable_mosaic.version = 11 : i64} {
  func.func @_salience_kernel(%arg0: i32, %arg1: i32, %arg2: i32, %arg3: memref<1x4x2x128xf32, #tpu.memory_space<vmem>>, %arg4: memref<1x4x2x128xf32, #tpu.memory_space<vmem>>, %arg5: memref<1x1x1x1xf32, #tpu.memory_space<vmem>>, %arg6: memref<2x128xf32, #tpu.memory_space<vmem>>) attributes {dimension_semantics = [#tpu.dimension_semantics<parallel>, #tpu.dimension_semantics<parallel>, #tpu.dimension_semantics<arbitrary>], iteration_bounds = array<i64: 2, 1, 1>, scalar_prefetch = 0 : i64, scratch_operands = 1 : i64, tpu.core_type = #tpu.core_type<tc>, window_params = [{transform_indices = @transform_0, window_bounds = array<i64: 1, 4, 2, 128>}, {transform_indices = @transform_1, window_bounds = array<i64: 1, 4, 2, 128>}, {transform_indices = @transform_2, window_bounds = array<i64: 1, 1, 1, 1>}]} {
    %c0_i32 = arith.constant 0 : i32
    %0 = arith.cmpi eq, %arg2, %c0_i32 : i32
    %1 = arith.extui %0 : i1 to i32
    %c0_i32_0 = arith.constant 0 : i32
    %2 = arith.cmpi ne, %1, %c0_i32_0 : i32
    scf.if %2 {
      %cst_38 = arith.constant 0.000000e+00 : f32
      %51 = vector.broadcast %cst_38 : f32 to vector<2x128xf32>
      %c0_39 = arith.constant 0 : index
      %c0_40 = arith.constant 0 : index
      %52 = vector.load %arg6[%c0_39, %c0_40] : memref<2x128xf32, #tpu.memory_space<vmem>>, vector<2x128xf32>
      tpu.vector_store %arg6[%c0_39, %c0_40], %51 {strides = array<i32>} : memref<2x128xf32, #tpu.memory_space<vmem>>, vector<2x128xf32>,
    } else {
    }
    %c0 = arith.constant 0 : index
    %c0_1 = arith.constant 0 : index
    %c0_2 = arith.constant 0 : index
    %c0_3 = arith.constant 0 : index
    %3 = vector.load %arg3[%c0, %c0_1, %c0_2, %c0_3] : memref<1x4x2x128xf32, #tpu.memory_space<vmem>>, vector<1x1x2x128xf32>
    %4 = vector.shape_cast %3 : vector<1x1x2x128xf32> to vector<2x128xf32>
    %c0_4 = arith.constant 0 : index
    %c0_5 = arith.constant 0 : index
    %c0_6 = arith.constant 0 : index
    %c0_7 = arith.constant 0 : index
    %5 = vector.load %arg4[%c0_4, %c0_5, %c0_6, %c0_7] : memref<1x4x2x128xf32, #tpu.memory_space<vmem>>, vector<1x1x2x128xf32>
    %6 = vector.shape_cast %5 : vector<1x1x2x128xf32> to vector<2x128xf32>
    %cst = arith.constant 1.000000e+00 : f32
    %7 = vector.broadcast %cst : f32 to vector<2x128xf32>
    %cst_8 = arith.constant 1.000000e+00 : f32
    %8 = vector.broadcast %cst_8 : f32 to vector<2x128xf32>
    %c0_9 = arith.constant 0 : index
    %c1 = arith.constant 1 : index
    %c0_10 = arith.constant 0 : index
    %c0_11 = arith.constant 0 : index
    %9 = vector.load %arg3[%c0_9, %c1, %c0_10, %c0_11] : memref<1x4x2x128xf32, #tpu.memory_space<vmem>>, vector<1x1x2x128xf32>
    %10 = vector.shape_cast %9 : vector<1x1x2x128xf32> to vector<2x128xf32>
    %11 = arith.subf %10, %4 : vector<2x128xf32>
    %12 = math.exp %11 : vector<2x128xf32>
    %13 = arith.addf %7, %12 : vector<2x128xf32>
    %c0_12 = arith.constant 0 : index
    %c1_13 = arith.constant 1 : index
    %c0_14 = arith.constant 0 : index
    %c0_15 = arith.constant 0 : index
    %14 = vector.load %arg4[%c0_12, %c1_13, %c0_14, %c0_15] : memref<1x4x2x128xf32, #tpu.memory_space<vmem>>, vector<1x1x2x128xf32>
    %15 = vector.shape_cast %14 : vector<1x1x2x128xf32> to vector<2x128xf32>
    %16 = arith.subf %15, %6 : vector<2x128xf32>
    %17 = math.exp %16 : vector<2x128xf32>
    %18 = arith.addf %8, %17 : vector<2x128xf32>
    %c0_16 = arith.constant 0 : index
    %c2 = arith.constant 2 : index
    %c0_17 = arith.constant 0 : index
    %c0_18 = arith.constant 0 : index
    %19 = vector.load %arg3[%c0_16, %c2, %c0_17, %c0_18] : memref<1x4x2x128xf32, #tpu.memory_space<vmem>>, vector<1x1x2x128xf32>
    %20 = vector.shape_cast %19 : vector<1x1x2x128xf32> to vector<2x128xf32>
    %21 = arith.subf %20, %4 : vector<2x128xf32>
    %22 = math.exp %21 : vector<2x128xf32>
    %23 = arith.addf %13, %22 : vector<2x128xf32>
    %c0_19 = arith.constant 0 : index
    %c2_20 = arith.constant 2 : index
    %c0_21 = arith.constant 0 : index
    %c0_22 = arith.constant 0 : index
    %24 = vector.load %arg4[%c0_19, %c2_20, %c0_21, %c0_22] : memref<1x4x2x128xf32, #tpu.memory_space<vmem>>, vector<1x1x2x128xf32>
    %25 = vector.shape_cast %24 : vector<1x1x2x128xf32> to vector<2x128xf32>
    %26 = arith.subf %25, %6 : vector<2x128xf32>
    %27 = math.exp %26 : vector<2x128xf32>
    %28 = arith.addf %18, %27 : vector<2x128xf32>
    %c0_23 = arith.constant 0 : index
    %c3 = arith.constant 3 : index
    %c0_24 = arith.constant 0 : index
    %c0_25 = arith.constant 0 : index
    %29 = vector.load %arg3[%c0_23, %c3, %c0_24, %c0_25] : memref<1x4x2x128xf32, #tpu.memory_space<vmem>>, vector<1x1x2x128xf32>
    %30 = vector.shape_cast %29 : vector<1x1x2x128xf32> to vector<2x128xf32>
    %31 = arith.subf %30, %4 : vector<2x128xf32>
    %32 = math.exp %31 : vector<2x128xf32>
    %33 = arith.addf %23, %32 : vector<2x128xf32>
    %c0_26 = arith.constant 0 : index
    %c3_27 = arith.constant 3 : index
    %c0_28 = arith.constant 0 : index
    %c0_29 = arith.constant 0 : index
    %34 = vector.load %arg4[%c0_26, %c3_27, %c0_28, %c0_29] : memref<1x4x2x128xf32, #tpu.memory_space<vmem>>, vector<1x1x2x128xf32>
    %35 = vector.shape_cast %34 : vector<1x1x2x128xf32> to vector<2x128xf32>
    %36 = arith.subf %35, %6 : vector<2x128xf32>
    %37 = math.exp %36 : vector<2x128xf32>
    %38 = arith.addf %28, %37 : vector<2x128xf32>
    %cst_30 = arith.constant 1.000000e+00 : f32
    %39 = vector.broadcast %cst_30 : f32 to vector<2x128xf32>
    %40 = arith.divf %39, %33 : vector<2x128xf32>
    %cst_31 = arith.constant 1.000000e+00 : f32
    %41 = vector.broadcast %cst_31 : f32 to vector<2x128xf32>
    %42 = arith.divf %41, %38 : vector<2x128xf32>
    %43 = arith.subf %40, %42 : vector<2x128xf32>
    %44 = arith.mulf %43, %43 : vector<2x128xf32>
    %c0_32 = arith.constant 0 : index
    %c0_33 = arith.constant 0 : index
    %45 = vector.load %arg6[%c0_32, %c0_33] : memref<2x128xf32, #tpu.memory_space<vmem>>, vector<2x128xf32>
    %46 = arith.addf %45, %44 : vector<2x128xf32>
    %c0_34 = arith.constant 0 : index
    %c0_35 = arith.constant 0 : index
    %47 = vector.load %arg6[%c0_34, %c0_35] : memref<2x128xf32, #tpu.memory_space<vmem>>, vector<2x128xf32>
    tpu.vector_store %arg6[%c0_34, %c0_35], %46 {strides = array<i32>} : memref<2x128xf32, #tpu.memory_space<vmem>>, vector<2x128xf32>,
    %c0_i32_36 = arith.constant 0 : i32
    %48 = arith.cmpi eq, %arg2, %c0_i32_36 : i32
    %49 = arith.extui %48 : i1 to i32
    %c0_i32_37 = arith.constant 0 : i32
    %50 = arith.cmpi ne, %49, %c0_i32_37 : i32
    scf.if %50 {
      %c0_38 = arith.constant 0 : index
      %c0_39 = arith.constant 0 : index
      %51 = vector.load %arg6[%c0_38, %c0_39] : memref<2x128xf32, #tpu.memory_space<vmem>>, vector<2x128xf32>
      %52 = vector.shape_cast %51 : vector<2x128xf32> to vector<1x2x128xf32>
      %cst_40 = arith.constant dense<0.000000e+00> : vector<1xf32>
      %53 = vector.multi_reduction <add>, %52, %cst_40 [1, 2] : vector<1x2x128xf32> to vector<1xf32>
      %54 = vector.shape_cast %53 : vector<1xf32> to vector<1x1x1xf32>
      %55 = vector.extract %54[0, 0, 0] : f32 from vector<1x1x1xf32>
      %56 = vector.broadcast %55 : f32 to vector<1x1x1x1xf32>
      %c0_41 = arith.constant 0 : index
      %c0_42 = arith.constant 0 : index
      %c0_43 = arith.constant 0 : index
      %c0_44 = arith.constant 0 : index
      %57 = vector.load %arg5[%c0_41, %c0_42, %c0_43, %c0_44] : memref<1x1x1x1xf32, #tpu.memory_space<vmem>>, vector<1x1x1x1xf32>
      tpu.vector_store %arg5[%c0_41, %c0_42, %c0_43, %c0_44], %56 {strides = array<i32>} : memref<1x1x1x1xf32, #tpu.memory_space<vmem>>, vector<1x1x1x1xf32>,
    } else {
    }
    return
  }
  func.func @transform_0(%arg0: i32, %arg1: i32, %arg2: i32) -> (i32, i32, i32, i32) {
    %c1_i32 = arith.constant 1 : i32
    %0 = arith.muli %arg1, %c1_i32 : i32
    %1 = arith.addi %0, %arg2 : i32
    %c0_i32 = arith.constant 0 : i32
    %c0_i32_0 = arith.constant 0 : i32
    %c0_i32_1 = arith.constant 0 : i32
    return %arg0, %c0_i32, %1, %c0_i32_0 : i32, i32, i32, i32
  }
  func.func @transform_1(%arg0: i32, %arg1: i32, %arg2: i32) -> (i32, i32, i32, i32) {
    %c1_i32 = arith.constant 1 : i32
    %0 = arith.muli %arg1, %c1_i32 : i32
    %1 = arith.addi %0, %arg2 : i32
    %c0_i32 = arith.constant 0 : i32
    %c0_i32_0 = arith.constant 0 : i32
    %c0_i32_1 = arith.constant 0 : i32
    return %arg0, %c0_i32, %1, %c0_i32_0 : i32, i32, i32, i32
  }
  func.func @transform_2(%arg0: i32, %arg1: i32, %arg2: i32) -> (i32, i32, i32, i32) {
    %c0_i32 = arith.constant 0 : i32
    %c0_i32_0 = arith.constant 0 : i32
    %c0_i32_1 = arith.constant 0 : i32
    return %arg0, %arg1, %c0_i32, %c0_i32_0 : i32, i32, i32, i32
  }
}

</mosaic_0001>

<bundles_post_ra>
// kernel: change_salience_loss.1
= control target key start
LH: loop header
LB: loop body
LE: loop exit
PB: predicated region body
PF: predicated region fallthrough
CT: control target
= control target key end

     0   :  { %s487_s9 = smov 0   ;;  %s489_s10 = smov 0   ;;  %s527_s0 = inlined_call_operand.vmem [shape: f32[2,4,2,128], index: 0, kind: input, shape index: {}]   ;;  %s528_s1 = inlined_call_operand.vmem [shape: f32[2,4,2,128], index: 1, kind: input, shape index: {}]   ;;  %s529_s2 = inlined_call_operand.vmem [shape: f32[2,1,1,1], index: 2, kind: output, shape index: {}]  }
   0x1   :  { %s491_s11 = smov 0  }
   0x2 LB: > { %s31_s12 = sadd.s32 1, %s465_s10  ;;  %p389_p0 = scmp.ge.s32.totalorder %s469_s11, 1  ;;  %s469_s11 = sphi %s491_s11, %s12_s11   ;;  %s465_s10 = sphi %s489_s10, %s531_s10   ;;  %s461_s9 = sphi %s487_s9, %s530_s9  }
   0x3   : > { %p33_p1 = scmp.ge.s32.totalorder %s31_s12, 2  ;;  %p161_p2 = scmp.lt.s32.totalorder %s469_s11, 3 }
   0x5   : > { %s533_s12 = smov (%p33_p1, %s31_s12), 0  ;;  %p162_p3 = pnand %p389_p0, %p161_p2 }
   0x6   : > { %p198_p4 = scmp.lt.s32.totalorder (!%p162_p3), %s461_s9, 1  ;;  %v471_v0 = vmov (!%p162_p3), 0.0   ;;  %vm279_vm0 = vcmask (!%p162_p3), 1041408   ;;  %vm291_vm1 = vcmask (!%p162_p3), 0  }
   0x7   : > { %165 = sbr.rel (%p162_p3) target bundleno = 272 (0x110), region = 28  ;;  %227 = vst [vmem:[#allocation2] sm:$0x3] (!%p162_p3), %v471_v0 }
   0xe   : > { %s535_s9 = smov (!%p198_p4, %s461_s9), 1  ;;  %v272_v36 = vld [vmem:[#allocation2] sm:$0x3] }
   0xf   : > { %s402_s13 = sshll.u32 %s535_s9, 3  ;;  %s222_s22 = scalar_lea.vmem %s529_s2, %s535_s9 }
  0x10   : > { %s205_s16 = scalar_lea.vmem %s527_s0, %s402_s13  ;;  %s215_s19 = scalar_lea.vmem %s528_s1, %s402_s13 }
  0x11   : > { %v228_v1 = vld [vmem:[%s205_s16] sm:$0x3]  ;;  %v394_v3 = vld [vmem:[%s205_s16 + $0x2] sm:$0x3]  ;;  %v396_v6 = vld [vmem:[%s205_s16 + $0x4] sm:$0x3] }
  0x12   : > { %v229_v2 = vld [vmem:[%s215_s19] sm:$0x3]  ;;  %v232_v4 = vsub.f32 %v394_v3, %v228_v1  ;;  %v395_v5 = vld [vmem:[%s215_s19 + $0x2] sm:$0x3]  ;;  %v397_v7 = vld [vmem:[%s215_s19 + $0x4] sm:$0x3]  ;;  %v244_v9 = vsub.f32 %v396_v6, %v228_v1 }
  0x13   : > { %v238_v8 = vsub.f32 %v395_v5, %v229_v2  ;;  %v250_v10 = vsub.f32 %v397_v7, %v229_v2  ;;  %v398_v11 = vld [vmem:[%s205_s16 + $0x6] sm:$0x3] }
  0x14   : > { %v399_v12 = vld [vmem:[%s215_s19 + $0x6] sm:$0x3]  ;;  %v233_v13 = vmul.f32 1.442695, %v232_v4  ;;  %v256_v14 = vsub.f32 %v398_v11, %v228_v1  ;;  %v245_v17 = vmul.f32 1.442695, %v244_v9 }
  0x15   : > { %v262_v15 = vsub.f32 %v399_v12, %v229_v2  ;;  %v239_v16 = vmul.f32 1.442695, %v238_v8  ;;  %v251_v18 = vmul.f32 1.442695, %v250_v10 }
  0x16   : > { %431 = vpow2.f32 %v233_v13  ;;  %v257_v19 = vmul.f32 1.442695, %v256_v14 }
  0x17   : > { %433 = vpow2.f32 %v239_v16  ;;  %v263_v20 = vmul.f32 1.442695, %v262_v15 }
  0x18   : > { %435 = vpow2.f32 %v245_v17 }
  0x19   : > { %437 = vpow2.f32 %v251_v18 }
  0x1a   : > { %439 = vpow2.f32 %v257_v19 }
  0x1b   : > { %441 = vpow2.f32 %v263_v20 }
  0x20   : > { %v432_v21 = vpop.eup %431 }
  0x21   : > { %v434_v22 = vpop.eup %433  ;;  %v235_v23 = vadd.f32 1.0, %v432_v21 }
  0x22   : > { %v436_v24 = vpop.eup %435  ;;  %v241_v25 = vadd.f32 1.0, %v434_v22 }
  0x23   : > { %v438_v26 = vpop.eup %437  ;;  %v247_v27 = vadd.f32 %v436_v24, %v235_v23 }
  0x24   : > { %v440_v28 = vpop.eup %439  ;;  %v253_v29 = vadd.f32 %v438_v26, %v241_v25 }
  0x25   : > { %v442_v30 = vpop.eup %441  ;;  %v259_v31 = vadd.f32 %v440_v28, %v247_v27 }
  0x26   : > { %v265_v32 = vadd.f32 %v442_v30, %v253_v29 }
  0x27   : > { %443 = vrcp.f32 %v259_v31 }
  0x28   : > { %445 = vrcp.f32 %v265_v32 }
  0x31   : > { %v444_v33 = vpop.eup %443 }
  0x32   : > { %v446_v34 = vpop.eup %445 }
  0x33   : > { %v270_v35 = vsub.f32 %v444_v33, %v446_v34 }
  0x35   : > { %v271_v37 = vmul.f32 %v270_v35, %v270_v35 }
  0x37   : > { %v273_v38 = vadd.f32 %v272_v36, %v271_v37 }
  0x39   : > { %274 = vst [vmem:[#allocation2] sm:$0x3] %v273_v38 }
  0x40   : > { %v278_v39 = vld [vmem:[#allocation2] sm:$0x3] }
  0x41   : > { %v280_v40 = vsel %vm279_vm0, %v278_v39, 0.0 }
  0x42   : > { %281 = vadd.xlane.f32.xlu0 %v280_v40 }
  0xcf   : > { %v282_v41 = vpop.xlane.xlu0 %281 }
  0xd0   : > { %v283_v42 = vrot.slane %v282_v41, 4 }
  0xd2   : > { %v284_v43 = vadd.f32 %v283_v42, %v282_v41 }
  0xd4   : > { %v285_v44 = vrot.slane %v284_v43, 2 }
  0xd6   : > { %v286_v45 = vadd.f32 %v285_v44, %v284_v43 }
  0xd8   : > { %v287_v46 = vrot.slane %v286_v45, 1 }
  0xda   : > { %v288_v47 = vadd.f32 %v287_v46, %v286_v45 }
  0xdc   : > { %404 = vpush %v288_v47 }
 0x10d   : > { %s405_s23 = spop %404 }
 0x10e   : > { %v290_v48 = vstv %s405_s23 }
 0x10f   : > { %292 = vst.msk [vmem:[%s222_s22] sm:$0x1] %vm291_vm1, %v290_v48 }
 0x110 PF: > { %s12_s11 = sadd.s32 1, %s469_s11   ;;  %s530_s9 = smov %s465_s10 }
 0x111   : > { %p9_p5 = scmp.ge.s32.totalorder %s12_s11, 4   ;;  %s531_s10 = smov %s533_s12 }
 0x113   :  { %11 = sbr.rel (!%p9_p5) target bundleno = 2 (0x2), region = 75 }

</bundles_post_ra>
